<compile_context>
chip_gen: v5e
topology: v5e:2x2
jax: 0.10.0
libtpu: 0.0.40
codegen_flags: <defaults>
</compile_context>

<pallas_src>
import jax
import jax.numpy as jnp
from jax.experimental import pallas as pl
from jax.experimental.pallas import tpu as pltpu


def _round_up(a, b):
    return ((a + b - 1) // b) * b


def _sublane_multiple(dtype):
    dt = jnp.dtype(dtype)
    if dt.itemsize == 4:
        return 8
    if dt.itemsize == 2:
        return 16
    return 32


def _pick_tile(dim, granule, max_tile):
    """Largest tile = granule * d, with d dividing ceil(dim/granule) and
    tile <= max(max_tile, granule).  Keeps padding within one granule."""
    g = max((dim + granule - 1) // granule, 1)
    max_g = max(max_tile // granule, 1)
    best = 1
    for d in range(1, min(g, max_g) + 1):
        if g % d == 0:
            best = d
    return best * granule, g * granule


def _lora_kernel(x_ref, wt_ref, bias_ref, xa_ref, bt_ref, o_ref, acc_ref):
    k = pl.program_id(2)

    @pl.when(k == 0)
    def _():
        acc_ref[...] = jnp.zeros_like(acc_ref)

    # Base matmul: x_tile [tm, tk] @ W0^T_tile [tk, tn] (W0 pre-transposed in
    # the wrapper -> plain MXU matmul, no in-loop transpose).
    acc_ref[...] += jnp.dot(x_ref[...], wt_ref[...],
                            preferred_element_type=jnp.float32)

    @pl.when(k == pl.num_programs(2) - 1)
    def _():
        # Epilogue, once per (i, j) output tile: rank-r up-projection of the
        # precomputed down-projection (scaling folded into B) + f32 bias.
        up = jnp.dot(xa_ref[...], bt_ref[...],
                     preferred_element_type=jnp.float32)   # [tm, tn]
        o_ref[...] = (acc_ref[...] + up + bias_ref[...]).astype(o_ref.dtype)


def lora_linear(x, w0, bias, lora_a, lora_b, *, lora_alpha=4,
                tm_max=256, tn_max=512, tk_max=1024):
    """x: [..., d_in]; w0: [d_out, d_in]; bias: [d_out];
    lora_a: [r, d_in] or None; lora_b: [d_out, r] or None."""
    d_out, d_in = w0.shape
    r = lora_a.shape[0] if lora_a is not None else 0
    scaling = float(lora_alpha) / float(r) if r > 0 else 0.0

    lead = x.shape[:-1]
    m = 1
    for s in lead:
        m *= s
    dtype = x.dtype
    x2d = x.reshape(m, d_in)

    sub = _sublane_multiple(dtype)
    tm, m_pad = _pick_tile(m, sub, tm_max)
    tn, n_pad = _pick_tile(d_out, 128, tn_max)
    tk, k_pad = _pick_tile(d_in, 128, tk_max)
    r_pad = _round_up(max(r, 1), 128)

    # Megacore: for small-m calls make sure the N "parallel" axis has >=2
    # tiles so both v7x TensorCores get work.
    if m_pad // tm == 1 and n_pad // tn < 2 and n_pad // 128 >= 2:
        ng = n_pad // 128
        best = 1
        for d in range(1, ng // 2 + 1):
            if ng % d == 0:
                best = d
        tn = best * 128

    def pad2d(a, rows, cols):
        pr, pc = rows - a.shape[0], cols - a.shape[1]
        if pr == 0 and pc == 0:
            return a
        return jnp.pad(a, ((0, pr), (0, pc)))

    x_p = pad2d(x2d, m_pad, k_pad)
    # Frozen weight: one-time layout change to [d_in, d_out] outside the hot path.
    wt_p = pad2d(w0.T.astype(dtype), k_pad, n_pad)
    # Bias stays f32 and is only applied in the f32 epilogue.
    bias_p = pad2d(bias.astype(jnp.float32).reshape(1, d_out), 1, n_pad)

    if r > 0:
        # Hoisted LoRA down-projection: xa = x @ A^T, tiny [m, r] result.
        xa = jnp.dot(x2d, lora_a.T.astype(dtype),
                     preferred_element_type=jnp.float32).astype(dtype)
        xa_p = pad2d(xa, m_pad, r_pad)
        # Fold scaling into B and pre-transpose to [r, d_out] once.
        bt_p = pad2d((lora_b * scaling).T.astype(dtype), r_pad, n_pad)
    else:
        xa_p = jnp.zeros((m_pad, r_pad), dtype)
        bt_p = jnp.zeros((r_pad, n_pad), dtype)

    grid = (m_pad // tm, n_pad // tn, k_pad // tk)

    out = pl.pallas_call(
        _lora_kernel,
        out_shape=jax.ShapeDtypeStruct((m_pad, n_pad), dtype),
        grid_spec=pltpu.PrefetchScalarGridSpec(
            num_scalar_prefetch=0,
            grid=grid,
            in_specs=[
                pl.BlockSpec((tm, tk), lambda i, j, k: (i, k)),      # x
                pl.BlockSpec((tk, tn), lambda i, j, k: (k, j)),      # W0^T
                pl.BlockSpec((1, tn), lambda i, j, k: (0, j)),       # bias (f32)
                pl.BlockSpec((tm, r_pad), lambda i, j, k: (i, 0)),   # x @ A^T
                pl.BlockSpec((r_pad, tn), lambda i, j, k: (0, j)),   # (B*scale)^T
            ],
            out_specs=pl.BlockSpec((tm, tn), lambda i, j, k: (i, j)),
            scratch_shapes=[
                pltpu.VMEM((tm, tn), jnp.float32),    # f32 accumulator
            ],
        ),
        compiler_params=pltpu.CompilerParams(
            dimension_semantics=("parallel", "parallel", "arbitrary"),
            vmem_limit_bytes=48 * 1024 * 1024,
        ),
    )(x_p, wt_p, bias_p, xa_p, bt_p)

    return out[:m, :d_out].reshape(*lead, d_out)


def lora_linear_ref(x, w0, bias, lora_a, lora_b, *, lora_alpha=4):
    r = lora_a.shape[0]
    scaling = float(lora_alpha) / float(r)
    base = jnp.einsum("...i,oi->...o", x, w0) + bias
    up = jnp.einsum("...r,or->...o",
                    jnp.einsum("...i,ri->...r", x, lora_a), lora_b)
    return base + up * scaling


if __name__ == "__main__":
    # Small shapes consistent with nn.Linear(d_in=32, d_out=64), r=4.
    batch, seq, d_in, d_out, r = 2, 8, 32, 64, 4

    key = jax.random.PRNGKey(0)
    kx, kw, kb, ka, kbb = jax.random.split(key, 5)

    x = jax.random.normal(kx, (batch, seq, d_in), dtype=jnp.float32)
    # Deterministic synthetic parameters (PyTorch init replaced by fixed PRNG;
    # lora_B initialized nonzero so the LoRA path is exercised numerically).
    w0 = jax.random.normal(kw, (d_out, d_in), dtype=jnp.float32) * 0.1
    bias = jax.random.normal(kb, (d_out,), dtype=jnp.float32) * 0.1
    lora_a = jax.random.normal(ka, (r, d_in), dtype=jnp.float32) * 0.1
    lora_b = jax.random.normal(kbb, (d_out, r), dtype=jnp.float32) * 0.1

    out = lora_linear(x, w0, bias, lora_a, lora_b, lora_alpha=4)
    out = jax.block_until_ready(out)

    ref = lora_linear_ref(x, w0, bias, lora_a, lora_b, lora_alpha=4)
    assert out.shape == (batch, seq, d_out)
    assert jnp.allclose(out, ref, atol=1e-5, rtol=1e-5), "mismatch vs reference"

    print("KERNEL_OK")
</pallas_src>

<mosaic_0001>
module attributes {stable_mosaic.version = 11 : i64} {
  func.func @_lora_kernel(%arg0: i32, %arg1: i32, %arg2: i32, %arg3: memref<16x128xf32, #tpu.memory_space<vmem>>, %arg4: memref<128x128xf32, #tpu.memory_space<vmem>>, %arg5: memref<1x128xf32, #tpu.memory_space<vmem>>, %arg6: memref<16x128xf32, #tpu.memory_space<vmem>>, %arg7: memref<128x128xf32, #tpu.memory_space<vmem>>, %arg8: memref<16x128xf32, #tpu.memory_space<vmem>>, %arg9: memref<16x128xf32, #tpu.memory_space<vmem>>) attributes {dimension_semantics = [#tpu.dimension_semantics<parallel>, #tpu.dimension_semantics<parallel>, #tpu.dimension_semantics<arbitrary>], iteration_bounds = array<i64: 1, 1, 1>, scalar_prefetch = 0 : i64, scratch_operands = 1 : i64, tpu.core_type = #tpu.core_type<tc>, window_params = [{transform_indices = @transform_0, window_bounds = array<i64: 16, 128>}, {transform_indices = @transform_1, window_bounds = array<i64: 128, 128>}, {transform_indices = @transform_2, window_bounds = array<i64: 1, 128>}, {transform_indices = @transform_3, window_bounds = array<i64: 16, 128>}, {transform_indices = @transform_4, window_bounds = array<i64: 128, 128>}, {transform_indices = @transform_5, window_bounds = array<i64: 16, 128>}]} {
    %c0_i32 = arith.constant 0 : i32
    %0 = arith.cmpi eq, %arg2, %c0_i32 : i32
    %1 = arith.extui %0 : i1 to i32
    %c0_i32_0 = arith.constant 0 : i32
    %2 = arith.cmpi ne, %1, %c0_i32_0 : i32
    scf.if %2 {
      %cst_10 = arith.constant 0.000000e+00 : f32
      %12 = vector.broadcast %cst_10 : f32 to vector<16x128xf32>
      %c0_11 = arith.constant 0 : index
      %c0_12 = arith.constant 0 : index
      %13 = vector.load %arg9[%c0_11, %c0_12] : memref<16x128xf32, #tpu.memory_space<vmem>>, vector<16x128xf32>
      tpu.vector_store %arg9[%c0_11, %c0_12], %12 {strides = array<i32>} : memref<16x128xf32, #tpu.memory_space<vmem>>, vector<16x128xf32>,
    } else {
    }
    %c0 = arith.constant 0 : index
    %c0_1 = arith.constant 0 : index
    %3 = vector.load %arg9[%c0, %c0_1] : memref<16x128xf32, #tpu.memory_space<vmem>>, vector<16x128xf32>
    %c0_2 = arith.constant 0 : index
    %c0_3 = arith.constant 0 : index
    %4 = vector.load %arg3[%c0_2, %c0_3] : memref<16x128xf32, #tpu.memory_space<vmem>>, vector<16x128xf32>
    %c0_4 = arith.constant 0 : index
    %c0_5 = arith.constant 0 : index
    %5 = vector.load %arg4[%c0_4, %c0_5] : memref<128x128xf32, #tpu.memory_space<vmem>>, vector<128x128xf32>
    %cst = arith.constant dense<0.000000e+00> : vector<16x128xf32>
    %6 = tpu.matmul %4, %5, %cst {dimension_numbers = #tpu.dot_dimension_numbers<[1], [0], [0], [1], [0, 0, 1, 1], [], []>} : vector<16x128xf32>, vector<128x128xf32>, vector<16x128xf32> -> vector<16x128xf32>
    %7 = arith.addf %3, %6 : vector<16x128xf32>
    %c0_6 = arith.constant 0 : index
    %c0_7 = arith.constant 0 : index
    %8 = vector.load %arg9[%c0_6, %c0_7] : memref<16x128xf32, #tpu.memory_space<vmem>>, vector<16x128xf32>
    tpu.vector_store %arg9[%c0_6, %c0_7], %7 {strides = array<i32>} : memref<16x128xf32, #tpu.memory_space<vmem>>, vector<16x128xf32>,
    %c0_i32_8 = arith.constant 0 : i32
    %9 = arith.cmpi eq, %arg2, %c0_i32_8 : i32
    %10 = arith.extui %9 : i1 to i32
    %c0_i32_9 = arith.constant 0 : i32
    %11 = arith.cmpi ne, %10, %c0_i32_9 : i32
    scf.if %11 {
      %c0_10 = arith.constant 0 : index
      %c0_11 = arith.constant 0 : index
      %12 = vector.load %arg6[%c0_10, %c0_11] : memref<16x128xf32, #tpu.memory_space<vmem>>, vector<16x128xf32>
      %c0_12 = arith.constant 0 : index
      %c0_13 = arith.constant 0 : index
      %13 = vector.load %arg7[%c0_12, %c0_13] : memref<128x128xf32, #tpu.memory_space<vmem>>, vector<128x128xf32>
      %cst_14 = arith.constant dense<0.000000e+00> : vector<16x128xf32>
      %14 = tpu.matmul %12, %13, %cst_14 {dimension_numbers = #tpu.dot_dimension_numbers<[1], [0], [0], [1], [0, 0, 1, 1], [], []>} : vector<16x128xf32>, vector<128x128xf32>, vector<16x128xf32> -> vector<16x128xf32>
      %c0_15 = arith.constant 0 : index
      %c0_16 = arith.constant 0 : index
      %15 = vector.load %arg9[%c0_15, %c0_16] : memref<16x128xf32, #tpu.memory_space<vmem>>, vector<16x128xf32>
      %16 = arith.addf %15, %14 : vector<16x128xf32>
      %c0_17 = arith.constant 0 : index
      %c0_18 = arith.constant 0 : index
      %17 = vector.load %arg5[%c0_17, %c0_18] : memref<1x128xf32, #tpu.memory_space<vmem>>, vector<1x128xf32>
      %18 = vector.broadcast %17 : vector<1x128xf32> to vector<16x128xf32>
      %19 = arith.addf %16, %18 : vector<16x128xf32>
      %c0_19 = arith.constant 0 : index
      %c0_20 = arith.constant 0 : index
      %20 = vector.load %arg8[%c0_19, %c0_20] : memref<16x128xf32, #tpu.memory_space<vmem>>, vector<16x128xf32>
      tpu.vector_store %arg8[%c0_19, %c0_20], %19 {strides = array<i32>} : memref<16x128xf32, #tpu.memory_space<vmem>>, vector<16x128xf32>,
    } else {
    }
    return
  }
  func.func @transform_0(%arg0: i32, %arg1: i32, %arg2: i32) -> (i32, i32) {
    %c0_i32 = arith.constant 0 : i32
    return %arg0, %arg2 : i32, i32
  }
  func.func @transform_1(%arg0: i32, %arg1: i32, %arg2: i32) -> (i32, i32) {
    %c0_i32 = arith.constant 0 : i32
    return %arg2, %arg1 : i32, i32
  }
  func.func @transform_2(%arg0: i32, %arg1: i32, %arg2: i32) -> (i32, i32) {
    %c0_i32 = arith.constant 0 : i32
    %c0_i32_0 = arith.constant 0 : i32
    return %c0_i32, %arg1 : i32, i32
  }
  func.func @transform_3(%arg0: i32, %arg1: i32, %arg2: i32) -> (i32, i32) {
    %c0_i32 = arith.constant 0 : i32
    %c0_i32_0 = arith.constant 0 : i32
    return %arg0, %c0_i32 : i32, i32
  }
  func.func @transform_4(%arg0: i32, %arg1: i32, %arg2: i32) -> (i32, i32) {
    %c0_i32 = arith.constant 0 : i32
    %c0_i32_0 = arith.constant 0 : i32
    return %c0_i32, %arg1 : i32, i32
  }
  func.func @transform_5(%arg0: i32, %arg1: i32, %arg2: i32) -> (i32, i32) {
    %c0_i32 = arith.constant 0 : i32
    return %arg0, %arg1 : i32, i32
  }
}

</mosaic_0001>

<bundles_post_ra>
// kernel: tpu_custom_call.1
= control target key start
LH: loop header
LB: loop body
LE: loop exit
PB: predicated region body
PF: predicated region fallthrough
CT: control target
= control target key end

     0   :  { %10 = vsyncpa [#allocation4], 0  ;;  %s452_s0 = inlined_call_operand.hbm [shape: f32[16,128], index: 0, kind: input, shape index: {}]   ;;  %s453_s1 = inlined_call_operand.hbm [shape: f32[128,128], index: 1, kind: input, shape index: {}]   ;;  %s454_s2 = inlined_call_operand.vmem [shape: f32[1,128], index: 2, kind: input, shape index: {}]   ;;  %s455_s3 = inlined_call_operand.hbm [shape: f32[16,128], index: 3, kind: input, shape index: {}]   ;;  %s456_s4 = inlined_call_operand.hbm [shape: f32[128,128], index: 4, kind: input, shape index: {}]   ;;  %s457_s5 = inlined_call_operand.hbm [shape: f32[16,128], index: 5, kind: output, shape index: {}]  }
   0x1   :  { %11 = vsyncpa [#allocation7], 0 }
   0x2   :  { %12 = vsyncpa [#allocation10], 0 }
   0x3   :  { %13 = vsyncpa [#allocation5], 0  ;;  %s31_s20 = sshll.u32 %s453_s1, 4  ;;  %s382_s21 = smov [#allocation6]   ;;  %s32_s20 = int_to_ptr.hbm [resolvable:$true] %s31_s20 }
   0x4   :  { %s33_s22 = sshll.u32 %s382_s21, 4  ;;  %s18_s25 = sshll.u32 %s452_s0, 4  ;;  %s34_s22 = int_to_ptr.vmem [resolvable:$true] %s33_s22  ;;  %s19_s25 = int_to_ptr.hbm [resolvable:$true] %s18_s25 }
   0x5   :  { %s383_s26 = smov 128   ;;  %s384_s27 = smov 8  }
   0x6   :  { %39 = dma.hbm_to_vmem [thread:$0]  %s32_s20, 2048, %s34_s22, [#allocation7], %s383_s26, %s383_s26, %s384_s27  }
   0x7   :  { %s385_s28 = smov [#allocation3]   ;;  %s46_s1 = sshll.u32 %s455_s3, 4  ;;  %s47_s1 = int_to_ptr.hbm [resolvable:$true] %s46_s1 }
   0x8   :  { %s20_s29 = sshll.u32 %s385_s28, 4  ;;  %s59_s8 = sshll.u32 %s456_s4, 4  ;;  %s21_s29 = int_to_ptr.vmem [resolvable:$true] %s20_s29  ;;  %s60_s8 = int_to_ptr.hbm [resolvable:$true] %s59_s8 }
   0x9   :  { %26 = dma.hbm_to_vmem [thread:$0]  %s19_s25, 256, %s21_s29, [#allocation4], %s383_s26, %s383_s26, %s384_s27  }
   0xa   :  { %s386_s9 = smov [#allocation8]   ;;  %s387_s11 = smov [#allocation9]  }
   0xb   :  { %s48_s10 = sshll.u32 %s386_s9, 4  ;;  %s61_s3 = sshll.u32 %s387_s11, 4  ;;  %s49_s10 = int_to_ptr.vmem [resolvable:$true] %s48_s10  ;;  %s62_s3 = int_to_ptr.vmem [resolvable:$true] %s61_s3 }
   0xc   :  { %54 = dma.hbm_to_vmem [thread:$0]  %s47_s1, 256, %s49_s10, [#allocation7], %s383_s26, %s383_s26, %s384_s27  }
   0xd   :  { %67 = dma.hbm_to_vmem [thread:$0]  %s60_s8, 2048, %s62_s3, [#allocation10], %s383_s26, %s383_s26, %s384_s27  }
   0xe   :  { %374 = dma.done.wait [#allocation4], 256  }
   0xf   :  { %375 = vsyncadd [#allocation4], 4294967040 }
  0x10   :  { %376 = dma.done.wait [#allocation7], 2304  }
  0x11   :  { %377 = vsyncadd [#allocation7], 4294964992 }
  0x12   :  { %378 = dma.done.wait [#allocation10], 2048  }
  0x13   :  { %379 = vsyncadd [#allocation10], 4294965248  ;;  %v109_v0 = vld [vmem:[#allocation6 + $0x78] sm:$0xff]  ;;  %v157_v1 = vld [vmem:[#allocation9 + $0x78] sm:$0xff]  ;;  %s388_s13 = smov [#allocation11]   ;;  %s199_s17 = sshll.u32 %s457_s5, 4  ;;  %s200_s17 = int_to_ptr.hbm [resolvable:$true] %s199_s17 }
  0x14   :  { %v108_v2 = vld [vmem:[#allocation6 + $0x70] sm:$0xff]  ;;  %214 = vmatpush.msra.mxu2 %v109_v0  ;;  %230 = vmatpush.msra.mxu3 %v157_v1  ;;  %v156_v3 = vld [vmem:[#allocation9 + $0x70] sm:$0xff]  ;;  %v107_v4 = vld [vmem:[#allocation6 + $0x68] sm:$0xff]  ;;  %s197_s14 = sshll.u32 %s388_s13, 4  ;;  %s198_s14 = int_to_ptr.vmem [resolvable:$true] %s197_s14 }
  0x15   :  { %v155_v5 = vld [vmem:[#allocation9 + $0x68] sm:$0xff]  ;;  %110 = vmatpush.msra.mxu0 %v109_v0  ;;  %158 = vmatpush.msra.mxu1 %v157_v1  ;;  %v106_v6 = vld [vmem:[#allocation6 + $0x60] sm:$0xff]  ;;  %v154_v7 = vld [vmem:[#allocation9 + $0x60] sm:$0xff] }
  0x16   :  { %215 = vmatpush.msra.mxu2 %v108_v2  ;;  %231 = vmatpush.msra.mxu3 %v156_v3  ;;  %v105_v8 = vld [vmem:[#allocation6 + $0x58] sm:$0xff]  ;;  %v153_v9 = vld [vmem:[#allocation9 + $0x58] sm:$0xff]  ;;  %v104_v10 = vld [vmem:[#allocation6 + $0x50] sm:$0xff] }
  0x17   :  { %111 = vmatpush.msra.mxu0 %v108_v2  ;;  %159 = vmatpush.msra.mxu1 %v156_v3  ;;  %v152_v11 = vld [vmem:[#allocation9 + $0x50] sm:$0xff]  ;;  %v103_v12 = vld [vmem:[#allocation6 + $0x48] sm:$0xff]  ;;  %v151_v13 = vld [vmem:[#allocation9 + $0x48] sm:$0xff] }
  0x18   :  { %216 = vmatpush.msra.mxu2 %v107_v4  ;;  %232 = vmatpush.msra.mxu3 %v155_v5  ;;  %v102_v14 = vld [vmem:[#allocation6 + $0x40] sm:$0xff]  ;;  %v150_v15 = vld [vmem:[#allocation9 + $0x40] sm:$0xff]  ;;  %v101_v16 = vld [vmem:[#allocation6 + $0x38] sm:$0xff] }
  0x19   :  { %112 = vmatpush.msra.mxu0 %v107_v4  ;;  %160 = vmatpush.msra.mxu1 %v155_v5  ;;  %v149_v17 = vld [vmem:[#allocation9 + $0x38] sm:$0xff]  ;;  %v100_v18 = vld [vmem:[#allocation6 + $0x30] sm:$0xff]  ;;  %v148_v19 = vld [vmem:[#allocation9 + $0x30] sm:$0xff] }
  0x1a   :  { %217 = vmatpush.msra.mxu2 %v106_v6  ;;  %233 = vmatpush.msra.mxu3 %v154_v7  ;;  %v99_v20 = vld [vmem:[#allocation6 + $0x28] sm:$0xff]  ;;  %v147_v21 = vld [vmem:[#allocation9 + $0x28] sm:$0xff]  ;;  %v98_v22 = vld [vmem:[#allocation6 + $0x20] sm:$0xff] }
  0x1b   :  { %113 = vmatpush.msra.mxu0 %v106_v6  ;;  %161 = vmatpush.msra.mxu1 %v154_v7  ;;  %v146_v23 = vld [vmem:[#allocation9 + $0x20] sm:$0xff]  ;;  %v97_v24 = vld [vmem:[#allocation6 + $0x18] sm:$0xff]  ;;  %v145_v25 = vld [vmem:[#allocation9 + $0x18] sm:$0xff] }
  0x1c   :  { %218 = vmatpush.msra.mxu2 %v105_v8  ;;  %234 = vmatpush.msra.mxu3 %v153_v9  ;;  %v96_v26 = vld [vmem:[#allocation6 + $0x10] sm:$0xff]  ;;  %v144_v27 = vld [vmem:[#allocation9 + $0x10] sm:$0xff]  ;;  %v95_v28 = vld [vmem:[#allocation6 + $0x8] sm:$0xff] }
  0x1d   :  { %114 = vmatpush.msra.mxu0 %v105_v8  ;;  %162 = vmatpush.msra.mxu1 %v153_v9  ;;  %v143_v29 = vld [vmem:[#allocation9 + $0x8] sm:$0xff]  ;;  %v94_v30 = vld [vmem:[#allocation6] sm:$0xff]  ;;  %v142_v31 = vld [vmem:[#allocation9] sm:$0xff] }
  0x1e   :  { %219 = vmatpush.msra.mxu2 %v104_v10  ;;  %235 = vmatpush.msra.mxu3 %v152_v11  ;;  %v93_v32 = vld [vmem:[#allocation3 + $0x8] sm:$0xff]  ;;  %v141_v33 = vld [vmem:[#allocation8 + $0x8] sm:$0xff]  ;;  %v92_v34 = vld [vmem:[#allocation3] sm:$0xff] }
  0x1f   :  { %115 = vmatpush.msra.mxu0 %v104_v10  ;;  %163 = vmatpush.msra.mxu1 %v152_v11  ;;  %v140_v35 = vld [vmem:[#allocation8] sm:$0xff]  ;;  %v253_v36 = vld [vmem:[%s454_s2] ss:$0 sm:$0xff] }
  0x20   :  { %220 = vmatpush.msra.mxu2 %v103_v12  ;;  %236 = vmatpush.msra.mxu3 %v151_v13 }
  0x21   :  { %116 = vmatpush.msra.mxu0 %v103_v12  ;;  %164 = vmatpush.msra.mxu1 %v151_v13 }
  0x22   :  { %221 = vmatpush.msra.mxu2 %v102_v14  ;;  %237 = vmatpush.msra.mxu3 %v150_v15 }
  0x23   :  { %117 = vmatpush.msra.mxu0 %v102_v14  ;;  %165 = vmatpush.msra.mxu1 %v150_v15 }
  0x24   :  { %222 = vmatpush.msra.mxu2 %v101_v16  ;;  %238 = vmatpush.msra.mxu3 %v149_v17 }
  0x25   :  { %118 = vmatpush.msra.mxu0 %v101_v16  ;;  %166 = vmatpush.msra.mxu1 %v149_v17 }
  0x26   :  { %223 = vmatpush.msra.mxu2 %v100_v18  ;;  %239 = vmatpush.msra.mxu3 %v148_v19 }
  0x27   :  { %119 = vmatpush.msra.mxu0 %v100_v18  ;;  %167 = vmatpush.msra.mxu1 %v148_v19 }
  0x28   :  { %224 = vmatpush.msra.mxu2 %v99_v20  ;;  %240 = vmatpush.msra.mxu3 %v147_v21 }
  0x29   :  { %120 = vmatpush.msra.mxu0 %v99_v20  ;;  %168 = vmatpush.msra.mxu1 %v147_v21 }
  0x2a   :  { %225 = vmatpush.msra.mxu2 %v98_v22  ;;  %241 = vmatpush.msra.mxu3 %v146_v23 }
  0x2b   :  { %121 = vmatpush.msra.mxu0 %v98_v22  ;;  %169 = vmatpush.msra.mxu1 %v146_v23 }
  0x2c   :  { %226 = vmatpush.msra.mxu2 %v97_v24  ;;  %242 = vmatpush.msra.mxu3 %v145_v25 }
  0x2d   :  { %122 = vmatpush.msra.mxu0 %v97_v24  ;;  %170 = vmatpush.msra.mxu1 %v145_v25 }
  0x2e   :  { %227 = vmatpush.msra.mxu2 %v96_v26  ;;  %243 = vmatpush.msra.mxu3 %v144_v27 }
  0x2f   :  { %123 = vmatpush.msra.mxu0 %v96_v26  ;;  %171 = vmatpush.msra.mxu1 %v144_v27 }
  0x30   :  { %228 = vmatpush.msra.mxu2 %v95_v28  ;;  %244 = vmatpush.msra.mxu3 %v143_v29 }
  0x31   :  { %124 = vmatpush.msra.mxu0 %v95_v28  ;;  %172 = vmatpush.msra.mxu1 %v143_v29 }
  0x32   :  { %229 = vmatpush.msra.mxu2 %v94_v30  ;;  %245 = vmatpush.msra.mxu3 %v142_v31 }
  0x33   :  { %129 = vmatmul.f32.vlgmr.msra.gmra.mxu2 %v93_v32  ;;  %177 = vmatmul.f32.vlgmr.msra.gmra.mxu3 %v141_v33 }
  0x34   :  { %125 = vmatpush.msra.mxu0 %v94_v30  ;;  %173 = vmatpush.msra.mxu1 %v142_v31 }
  0x35   :  { %126 = vmatmul.f32.vlgmr.msra.gmra.mxu0 %v92_v34  ;;  %174 = vmatmul.f32.vlgmr.msra.gmra.mxu1 %v140_v35 }
  0xb2   :  { %v127_v37 = vpop.f32.mrf.mxu0  ;;  %v175_v38 = vpop.f32.mrf.mxu1 }
  0xb3   :  { %v183_v39 = vadd.f32 %v175_v38, %v127_v37 }
  0xb5   :  { %v189_v40 = vadd.f32 %v253_v36, %v183_v39 }
  0xb6   :  { %v130_v41 = vpop.f32.mrf.mxu2  ;;  %v178_v42 = vpop.f32.mrf.mxu3 }
  0xb7   :  { %191 = vst [vmem:[#allocation11] sm:$0xff] %v189_v40  ;;  %v184_v43 = vadd.f32 %v178_v42, %v130_v41 }
  0xb9   :  { %v190_v44 = vadd.f32 %v253_v36, %v184_v43 }
  0xbb   :  { %192 = vst [vmem:[#allocation11 + $0x8] sm:$0xff] %v190_v44 }
  0xbc   :  { %205 = dma.vmem_to_hbm [thread:$0]  %s198_s14, 256, %s200_s17, [#allocation5], %s383_s26, %s383_s26, %s384_s27  }
  0xbd   :  { %380 = dma.done.wait [#allocation5], 256  }
  0xbe   :  { %381 = vsyncadd [#allocation5], 4294967040 }
  0xbf   :  { %210 = vsyncpa [#allocation4], 1 }
  0xc0   :  { %211 = vsyncpa [#allocation7], 1 }
  0xc1   :  { %212 = vsyncpa [#allocation10], 1 }
  0xc2   :  { %213 = vsyncpa [#allocation5], 1 }

</bundles_post_ra>
